<compile_context>
chip_gen: v5e
topology: v5e:2x2
jax: 0.10.0
libtpu: 0.0.40
codegen_flags: <defaults>
</compile_context>

<pallas_src>
from functools import partial

import jax
import jax.numpy as jnp
from jax.experimental import pallas as pl
from jax.experimental.pallas import tpu as pltpu


# Haar mixing: band = 0.5 * sum_tap S[band, tap] * tap, with band order
# [LL, (W-lo,H-hi), (W-hi,H-lo), HH] matching pytorch_wavelets' (yL, yH[...,0],
# yH[...,1], yH[...,2]) for wave='haar', mode='zero', and tap order
# [(dy,dx)=(0,0),(0,1),(1,0),(1,1)].  S is symmetric (2x2 Hadamard ⊗ itself).
_HAAR_S = jnp.array(
    [[1.0,  1.0,  1.0,  1.0],
     [1.0,  1.0, -1.0, -1.0],
     [1.0, -1.0,  1.0, -1.0],
     [1.0, -1.0, -1.0,  1.0]], dtype=jnp.float32)


def _hwd_matmul_kernel(p_ref, w_ref, s_ref, o_ref):
    # p_ref: (1, 4*Cin, S_blk)  im2col'd 2x2 taps, spatial-minor (lane-dense)
    # w_ref: (Cout, 4*Cin)      Haar + BN-scale folded conv weight
    # s_ref: (Cout, 1)          BN shift with folded conv bias
    # o_ref: (1, Cout, S_blk)
    acc = jnp.dot(w_ref[...], p_ref[0],
                  preferred_element_type=jnp.float32)       # (Cout, S_blk), MXU
    o_ref[0] = jnp.maximum(acc + s_ref[...], 0.0).astype(o_ref.dtype)


def _pick_rows_per_block(Ho, Wo, K, Cout, n_batch, dtype_bytes=4,
                         vmem_budget=12 * 1024 * 1024):
    """Pick a whole-output-row block size.

    Preference order:
      1. largest divisor of Ho whose lane extent (rows*Wo) is a multiple of 128
         (unmasked lane-dense stores) and whose double-buffered in+out tiles
         stay under `vmem_budget` (well inside v5e's 16 MiB scoped VMEM);
         when batch == 1, prefer >= 2 row blocks so a 'parallel' spatial grid
         axis exists for megacore sharding;
      2. largest divisor that fits the VMEM budget (may end in masked stores);
      3. single row per block (never blow VMEM on huge shapes).
    """
    def footprint(t):  # double-buffered input patches + output tile
        return 2 * (K + Cout) * t * Wo * dtype_bytes

    divisors = [t for t in range(1, Ho + 1) if Ho % t == 0]

    lane_ok = [t for t in divisors
               if (t * Wo) % 128 == 0 and footprint(t) <= vmem_budget]
    if lane_ok:
        if n_batch == 1:
            multi = [t for t in lane_ok if t <= Ho // 2]
            if multi:
                return max(multi)
        return max(lane_ok)

    fits = [t for t in divisors if footprint(t) <= vmem_budget]
    if fits:
        return max(fits)
    return 1


@partial(jax.jit, static_argnames=("eps",))
def hwd_forward(x, conv_w, conv_b, gamma, beta, run_mean, run_var, *, eps=1e-5):
    """Pallas implementation of HWD.forward (inference-mode BatchNorm)."""
    N, C, H, W = x.shape
    Cout, Kin, kh, kw = conv_w.shape
    assert kh == 1 and kw == 1, "HWD uses a 1x1 conv"
    assert Kin == 4 * C, "conv in-channels must be 4 * in_ch"
    assert H % 2 == 0 and W % 2 == 0, "even H/W required (see TODO)"
    Ho, Wo = H // 2, W // 2
    SP = Ho * Wo
    K = 4 * C

    x = x.astype(jnp.float32)

    # ---- space-to-depth (the DWT's data permutation): pure data movement,
    #      done once by XLA at HBM bandwidth (fused inside this jit).
    #      patches[n, (dy*2+dx)*C + c, i*Wo + j] = x[n, c, 2i+dy, 2j+dx]
    x6 = x.reshape(N, C, Ho, 2, Wo, 2)
    patches = jnp.transpose(x6, (0, 3, 5, 1, 2, 4)).reshape(N, K, SP)

    # ---- fold Haar DWT + BN(eval) scale + conv bias into one affine map
    w_bands = conv_w.reshape(Cout, 4, C).astype(jnp.float32)       # (o, band, c)
    w_taps = 0.5 * jnp.einsum('obc,bt->otc', w_bands, _HAAR_S)     # (o, tap, c)
    scale = (gamma / jnp.sqrt(run_var + eps)).astype(jnp.float32)  # (Cout,)
    w_fold = w_taps.reshape(Cout, K) * scale[:, None]              # (Cout, 4C)
    shift = (beta + (conv_b - run_mean) * scale).astype(jnp.float32)
    shift = shift.reshape(Cout, 1)

    # ---- tiling: blocks of whole output rows; lane dim = rows_per_block * Wo
    rows_per_block = _pick_rows_per_block(Ho, Wo, K, Cout, N)
    s_blk = rows_per_block * Wo
    n_row_blocks = Ho // rows_per_block

    cost = pl.CostEstimate(
        flops=2 * N * Cout * K * SP,
        transcendentals=0,
        bytes_accessed=4 * (N * K * SP + Cout * K + Cout + N * Cout * SP),
    )

    out = pl.pallas_call(
        _hwd_matmul_kernel,
        out_shape=jax.ShapeDtypeStruct((N, Cout, SP), jnp.float32),
        grid_spec=pltpu.PrefetchScalarGridSpec(
            num_scalar_prefetch=0,
            grid=(N, n_row_blocks),
            in_specs=[
                pl.BlockSpec((1, K, s_blk), lambda n, r: (n, 0, r)),
                pl.BlockSpec((Cout, K), lambda n, r: (0, 0)),   # VMEM-resident
                pl.BlockSpec((Cout, 1), lambda n, r: (0, 0)),   # VMEM-resident
            ],
            out_specs=pl.BlockSpec((1, Cout, s_blk), lambda n, r: (n, 0, r)),
        ),
        compiler_params=pltpu.CompilerParams(
            dimension_semantics=("parallel", "parallel"),
            vmem_limit_bytes=32 * 1024 * 1024,
        ),
        cost_estimate=cost,
    )(patches, w_fold, shift)

    return out.reshape(N, Cout, Ho, Wo)  # stays NCHW, matching PyTorch


def _reference(x, conv_w, conv_b, gamma, beta, run_mean, run_var, *, eps=1e-5):
    """Plain-JAX mirror of HWD.forward: Haar DWT (J=1, zero mode, even H/W),
    concat [yL, yHL, yLH, yHH] on channels, 1x1 conv (+bias), BN(eval), ReLU."""
    N, C, H, W = x.shape
    a = x[:, :, 0::2, 0::2]
    b = x[:, :, 0::2, 1::2]
    c = x[:, :, 1::2, 0::2]
    d = x[:, :, 1::2, 1::2]
    yL = 0.5 * (a + b + c + d)
    yHL = 0.5 * (a + b - c - d)   # yH[0][:, :, 0]
    yLH = 0.5 * (a - b + c - d)   # yH[0][:, :, 1]
    yHH = 0.5 * (a - b - c + d)   # yH[0][:, :, 2]
    cat = jnp.concatenate([yL, yHL, yLH, yHH], axis=1)     # (N, 4C, H/2, W/2)
    w = conv_w.reshape(conv_w.shape[0], 4 * C)
    y = jnp.einsum('nkhw,ok->nohw', cat, w) + conv_b.reshape(1, -1, 1, 1)
    scale = gamma / jnp.sqrt(run_var + eps)
    shift = beta - run_mean * scale
    y = y * scale.reshape(1, -1, 1, 1) + shift.reshape(1, -1, 1, 1)
    return jnp.maximum(y, 0.0)


if __name__ == "__main__":
    # HWD(in_ch=4, out_ch=8) on x of shape (2, 4, 16, 16) -> (2, 8, 8, 8)
    N, Cin, H, W = 2, 4, 16, 16
    Cout = 8
    eps = 1e-5

    key = jax.random.PRNGKey(0)
    kx, kw, kb, kg, kbt, km, kv = jax.random.split(key, 7)

    x = jax.random.normal(kx, (N, Cin, H, W), jnp.float32)

    # Conv2d(4*Cin, Cout, k=1) default init bounds (deterministic here)
    fan_in = 4 * Cin
    bound = 1.0 / (fan_in ** 0.5)
    conv_w = jax.random.uniform(kw, (Cout, 4 * Cin, 1, 1), jnp.float32,
                                minval=-bound, maxval=bound)
    conv_b = jax.random.uniform(kb, (Cout,), jnp.float32,
                                minval=-bound, maxval=bound)

    # BatchNorm parameters / running stats (eval mode), non-trivial values
    gamma = 1.0 + 0.1 * jax.random.normal(kg, (Cout,), jnp.float32)
    beta = 0.1 * jax.random.normal(kbt, (Cout,), jnp.float32)
    run_mean = 0.1 * jax.random.normal(km, (Cout,), jnp.float32)
    run_var = 1.0 + 0.1 * jax.random.uniform(kv, (Cout,), jnp.float32)

    out = hwd_forward(x, conv_w, conv_b, gamma, beta, run_mean, run_var, eps=eps)
    out = jax.block_until_ready(out)

    ref = _reference(x, conv_w, conv_b, gamma, beta, run_mean, run_var, eps=eps)
    assert out.shape == (N, Cout, H // 2, W // 2), out.shape
    max_err = float(jnp.max(jnp.abs(out - ref)))
    assert jnp.allclose(out, ref, atol=1e-3, rtol=1e-3), max_err

    print("KERNEL_OK")
</pallas_src>

<mosaic_0001>
module attributes {stable_mosaic.version = 11 : i64} {
  func.func @_hwd_matmul_kernel(%arg0: i32, %arg1: i32, %arg2: memref<1x16x64xf32, #tpu.memory_space<vmem>>, %arg3: memref<8x16xf32, #tpu.memory_space<vmem>>, %arg4: memref<8x1xf32, #tpu.memory_space<vmem>>, %arg5: memref<1x8x64xf32, #tpu.memory_space<vmem>>) attributes {dimension_semantics = [#tpu.dimension_semantics<parallel>, #tpu.dimension_semantics<parallel>], iteration_bounds = array<i64: 2, 1>, scalar_prefetch = 0 : i64, scratch_operands = 0 : i64, tpu.core_type = #tpu.core_type<tc>, window_params = [{transform_indices = @transform_0, window_bounds = array<i64: 1, 16, 64>}, {pipeline_mode = #tpu.pipeline_mode<synchronous>, transform_indices = @transform_1, window_bounds = array<i64: 8, 16>}, {pipeline_mode = #tpu.pipeline_mode<synchronous>, transform_indices = @transform_2, window_bounds = array<i64: 8, 1>}, {transform_indices = @transform_3, window_bounds = array<i64: 1, 8, 64>}]} {
    %c0 = arith.constant 0 : index
    %c0_0 = arith.constant 0 : index
    %0 = vector.load %arg3[%c0, %c0_0] : memref<8x16xf32, #tpu.memory_space<vmem>>, vector<8x16xf32>
    %c0_1 = arith.constant 0 : index
    %c0_2 = arith.constant 0 : index
    %c0_3 = arith.constant 0 : index
    %1 = vector.load %arg2[%c0_1, %c0_2, %c0_3] : memref<1x16x64xf32, #tpu.memory_space<vmem>>, vector<1x16x64xf32>
    %2 = vector.shape_cast %1 : vector<1x16x64xf32> to vector<16x64xf32>
    %cst = arith.constant dense<0.000000e+00> : vector<8x64xf32>
    %3 = tpu.matmul %0, %2, %cst {dimension_numbers = #tpu.dot_dimension_numbers<[1], [0], [0], [1], [0, 0, 1, 1], [], []>} : vector<8x16xf32>, vector<16x64xf32>, vector<8x64xf32> -> vector<8x64xf32>
    %c0_4 = arith.constant 0 : index
    %c0_5 = arith.constant 0 : index
    %4 = vector.load %arg4[%c0_4, %c0_5] : memref<8x1xf32, #tpu.memory_space<vmem>>, vector<8x1xf32>
    %5 = vector.broadcast %4 : vector<8x1xf32> to vector<8x64xf32>
    %6 = arith.addf %3, %5 : vector<8x64xf32>
    %cst_6 = arith.constant 0.000000e+00 : f32
    %7 = vector.broadcast %cst_6 : f32 to vector<8x64xf32>
    %8 = arith.maximumf %6, %7 : vector<8x64xf32>
    %c0_7 = arith.constant 0 : index
    %c0_8 = arith.constant 0 : index
    %c0_9 = arith.constant 0 : index
    %9 = vector.load %arg5[%c0_7, %c0_8, %c0_9] : memref<1x8x64xf32, #tpu.memory_space<vmem>>, vector<1x8x64xf32>
    %10 = vector.shape_cast %9 : vector<1x8x64xf32> to vector<8x64xf32>
    %11 = vector.shape_cast %8 : vector<8x64xf32> to vector<1x8x64xf32>
    tpu.vector_store %arg5[%c0_7, %c0_8, %c0_9], %11 {strides = array<i32>} : memref<1x8x64xf32, #tpu.memory_space<vmem>>, vector<1x8x64xf32>,
    return
  }
  func.func @transform_0(%arg0: i32, %arg1: i32) -> (i32, i32, i32) {
    %c0_i32 = arith.constant 0 : i32
    %c0_i32_0 = arith.constant 0 : i32
    return %arg0, %c0_i32, %arg1 : i32, i32, i32
  }
  func.func @transform_1(%arg0: i32, %arg1: i32) -> (i32, i32) {
    %c0_i32 = arith.constant 0 : i32
    %c0_i32_0 = arith.constant 0 : i32
    %c0_i32_1 = arith.constant 0 : i32
    return %c0_i32, %c0_i32_0 : i32, i32
  }
  func.func @transform_2(%arg0: i32, %arg1: i32) -> (i32, i32) {
    %c0_i32 = arith.constant 0 : i32
    %c0_i32_0 = arith.constant 0 : i32
    %c0_i32_1 = arith.constant 0 : i32
    return %c0_i32, %c0_i32_0 : i32, i32
  }
  func.func @transform_3(%arg0: i32, %arg1: i32) -> (i32, i32, i32) {
    %c0_i32 = arith.constant 0 : i32
    %c0_i32_0 = arith.constant 0 : i32
    return %arg0, %c0_i32, %arg1 : i32, i32, i32
  }
}

</mosaic_0001>

<bundles_post_ra>
// kernel: hwd_forward.1
= control target key start
LH: loop header
LB: loop body
LE: loop exit
PB: predicated region body
PF: predicated region fallthrough
CT: control target
= control target key end

     0   :  { %s396_s12 = smov 0   ;;  %s398_s13 = smov 0   ;;  %s435_s0 = inlined_call_operand.vmem [shape: f32[2,16,64], index: 0, kind: input, shape index: {}]   ;;  %s436_s1 = inlined_call_operand.vmem [shape: f32[8,16], index: 1, kind: input, shape index: {}]   ;;  %s437_s2 = inlined_call_operand.vmem [shape: f32[8,1], index: 2, kind: input, shape index: {}]   ;;  %s438_s3 = inlined_call_operand.vmem [shape: f32[2,8,64], index: 3, kind: output, shape index: {}]  }
   0x1   :  { %s400_s14 = smov 0  }
   0x2 LB: > { %s25_s15 = sadd.s32 1, %s369_s13  ;;  %p317_p0 = scmp.ge.s32.totalorder %s373_s14, 1  ;;  %s373_s14 = sphi %s400_s14, %s13_s14   ;;  %s369_s13 = sphi %s398_s13, %s440_s13   ;;  %s365_s12 = sphi %s396_s12, %s439_s12  }
   0x3   : > { %p27_p1 = scmp.ge.s32.totalorder %s25_s15, 2  ;;  %p156_p2 = scmp.lt.s32.totalorder %s373_s14, 3 }
   0x5   : > { %s442_s15 = smov (%p27_p1, %s25_s15), 0  ;;  %p157_p3 = pnand %p317_p0, %p156_p2 }
   0x6   : > { %p185_p4 = scmp.lt.s32.totalorder (!%p157_p3), %s365_s12, 1 }
   0x7   : > { %160 = sbr.rel (%p157_p3) target bundleno = 150 (0x96), region = 32 }
   0xc   : > { %v203_v0 = vld [vmem:[%s437_s2] sm:$0xff]  ;;  %v375_v1 = vmov 0   ;;  %s444_s12 = smov (!%p185_p4, %s365_s12), 1  ;;  %vm209_vm0 = vcmask 130048   ;;  %vm234_vm1 = vcmask 523264  }
   0xd   : > { %350 = vset.pattern.permute.xlu0 %v375_v1  ;;  %s324_s18 = sshll.u32 %s444_s12, 4  ;;  %v200_v4 = vld [vmem:[%s436_s1] sm:$0xff]  ;;  %s320_s24 = sshll.u32 %s444_s12, 3 }
   0xe   : > { %206 = vperm.xlu0 %350, %v203_v0   ;;  %s192_s21 = scalar_lea.vmem %s435_s0, %s324_s18  ;;  %s199_s27 = scalar_lea.vmem %s438_s3, %s320_s24 }
   0xf   : > { %v202_v2 = vld [vmem:[%s192_s21 + $0x8] sm:$0xff]  ;;  %v201_v3 = vld [vmem:[%s192_s21] sm:$0xff] }
  0x10   : > { %227 = vmatpush.msra.mxu0 %v202_v2 }
  0x12   : > { %228 = vmatpush.msra.mxu0 %v201_v3 }
  0x13   : > { %321 = vmatmul.msk.f32.vlgmr.msra.gmra.mxu0 %vm209_vm0, %v200_v4 }
  0x80   : > { %v207_v5 = vpop.permute.xlu0 %206 }
  0x90   : > { %v230_v6 = vpop.f32.mrf.mxu0 }
  0x91   : > { %v231_v7 = vadd.f32 %v230_v6, %v207_v5 }
  0x93   : > { %v233_v8 = vmax.f32 %v231_v7, 0.0 }
  0x95   : > { %235 = vst.msk [vmem:[%s199_s27] sm:$0xff] %vm234_vm1, %v233_v8 }
  0x96 PF: > { %s13_s14 = sadd.s32 1, %s373_s14   ;;  %s439_s12 = smov %s369_s13 }
  0x97   : > { %p10_p5 = scmp.ge.s32.totalorder %s13_s14, 4   ;;  %s440_s13 = smov %s442_s15 }
  0x99   :  { %12 = sbr.rel (!%p10_p5) target bundleno = 2 (0x2), region = 62 }

</bundles_post_ra>
